<compile_context>
chip_gen: v7x
topology: tpu7x:2x2x1
jax: 0.10.0
libtpu: 0.0.40
codegen_flags: <defaults>
</compile_context>

<pallas_src>
import functools

import jax
import jax.numpy as jnp
from jax import lax
from jax.experimental import pallas as pl
from jax.experimental.pallas import tpu as pltpu

_EPS = 1e-5  # PyTorch BatchNorm2d default eps


# ----------------------------- Pallas kernels ------------------------------

def _conv_k2_same_core(xin_ref, mask_ref, w_ref, b_ref, xcol_ref,
                       y_ref, s_ref, ss_ref, *, w_img):
    """Shared conv core for one image.

    xin_ref : (Cin, H*W) assembled input (cond already added, previous BN/ReLU
              already applied if fused).
    Builds the k=2 'same' im2col in VMEM (xcol_ref: (4*Cin, H*W)), runs one
    MXU matmul + bias, stores the pre-BN conv output and per-channel partial
    sum / sum-of-squares for the cross-batch BatchNorm reduction.
    """
    cin, hw = xin_ref.shape
    # Zero once: the unwritten tails of each shifted row-block stay 0, which is
    # exactly the bottom/right zero padding of the k=2 'same' conv.
    xcol_ref[...] = jnp.zeros_like(xcol_ref)
    # taps (di, dj) in row-major order -> flat lane shifts (0, 1, W, W+1)
    for t, s in enumerate((0, 1, w_img, w_img + 1)):
        rows = pl.ds(t * cin, cin)
        if s == 0:
            xcol_ref[rows, :] = xin_ref[...]
        else:
            piece = xin_ref[:, pl.ds(s, hw - s)]
            if s in (1, w_img + 1):
                # kill contributions that would cross the right image edge
                piece = piece * mask_ref[:, pl.ds(0, hw - s)]
            xcol_ref[rows, pl.ds(0, hw - s)] = piece
    acc = jnp.dot(w_ref[...], xcol_ref[...],
                  preferred_element_type=jnp.float32) + b_ref[...]
    y_ref[...] = acc
    # lane (XLU) reductions -> per-channel partial BN statistics
    s_ref[...] = jnp.sum(acc, axis=1, keepdims=True)
    ss_ref[...] = jnp.sum(acc * acc, axis=1, keepdims=True)


def _stage1_kernel(x2_ref, up_ref, cond_ref, mask_ref, w_ref, b_ref,
                   y_ref, s_ref, ss_ref, xin_ref, xcol_ref,
                   *, c_skip, c_up, w_img):
    # Fused channel-concat([x2, up]) + cond add (no HBM concat materialized).
    xin_ref[pl.ds(0, c_skip), :] = x2_ref[...] + cond_ref[pl.ds(0, c_skip), :]
    xin_ref[pl.ds(c_skip, c_up), :] = up_ref[...] + cond_ref[pl.ds(c_skip, c_up), :]
    _conv_k2_same_core(xin_ref, mask_ref, w_ref, b_ref, xcol_ref,
                       y_ref, s_ref, ss_ref, w_img=w_img)


def _stage_fused_kernel(y_in_ref, sc_ref, sh_ref, cond_ref, mask_ref, w_ref,
                        b_ref, y_ref, s_ref, ss_ref, xin_ref, xcol_ref,
                        *, w_img):
    # Fused BatchNorm+ReLU of the previous stage (global batch stats folded
    # into per-channel scale/shift) + cond add, then this stage's conv.
    h = jnp.maximum(sc_ref[...] * y_in_ref[...] + sh_ref[...], 0.0)
    xin_ref[...] = h + cond_ref[...]
    _conv_k2_same_core(xin_ref, mask_ref, w_ref, b_ref, xcol_ref,
                       y_ref, s_ref, ss_ref, w_img=w_img)


def _bn_relu_kernel(y_ref, sc_ref, sh_ref, o_ref):
    o_ref[...] = jnp.maximum(sc_ref[...] * y_ref[...] + sh_ref[...], 0.0)


def _up_taps_kernel(x_ref, w_ref, b_ref, o_ref):
    # ConvTranspose2d(k=2, s=2, pad=0) is non-overlapping: one matmul per image
    # producing the 4 sub-pixel taps stacked along the channel (sublane) axis.
    o_ref[...] = jnp.dot(w_ref[...], x_ref[...],
                         preferred_element_type=jnp.float32) + b_ref[...]


# ------------------------------ pallas_call wrappers ------------------------

def _parallel_params():
    return pltpu.CompilerParams(dimension_semantics=("parallel",))


def up_taps_pallas(x1r, w_all, b_all):
    B, cin, hw1 = x1r.shape
    n_rows = w_all.shape[0]  # 4 * Cout
    return pl.pallas_call(
        _up_taps_kernel,
        out_shape=jax.ShapeDtypeStruct((B, n_rows, hw1), jnp.float32),
        grid=(B,),
        in_specs=[pl.BlockSpec((None, cin, hw1), lambda b: (b, 0, 0)),
                  pl.BlockSpec((n_rows, cin), lambda b: (0, 0)),
                  pl.BlockSpec((n_rows, 1), lambda b: (0, 0))],
        out_specs=pl.BlockSpec((None, n_rows, hw1), lambda b: (b, 0, 0)),
        compiler_params=_parallel_params(),
    )(x1r, w_all, b_all)


def conv_stage1_pallas(x2r, upr, cond, colmask, wflat, bcol, w_img):
    B, c_skip, hw = x2r.shape
    c_up = upr.shape[1]
    cin = c_skip + c_up
    cout = wflat.shape[0]
    kernel = functools.partial(_stage1_kernel, c_skip=c_skip, c_up=c_up,
                               w_img=w_img)
    cost = pl.CostEstimate(
        flops=2 * B * cout * 4 * cin * hw,
        transcendentals=0,
        bytes_accessed=4 * (B * cin * hw + B * cout * hw + cout * 4 * cin
                            + 2 * B * cout))
    return pl.pallas_call(
        kernel,
        out_shape=(jax.ShapeDtypeStruct((B, cout, hw), jnp.float32),
                   jax.ShapeDtypeStruct((B, cout, 1), jnp.float32),
                   jax.ShapeDtypeStruct((B, cout, 1), jnp.float32)),
        grid=(B,),
        in_specs=[pl.BlockSpec((None, c_skip, hw), lambda b: (b, 0, 0)),
                  pl.BlockSpec((None, c_up, hw), lambda b: (b, 0, 0)),
                  pl.BlockSpec((None, cin, 1), lambda b: (b, 0, 0)),
                  pl.BlockSpec((1, hw), lambda b: (0, 0)),
                  pl.BlockSpec((cout, 4 * cin), lambda b: (0, 0)),
                  pl.BlockSpec((cout, 1), lambda b: (0, 0))],
        out_specs=(pl.BlockSpec((None, cout, hw), lambda b: (b, 0, 0)),
                   pl.BlockSpec((None, cout, 1), lambda b: (b, 0, 0)),
                   pl.BlockSpec((None, cout, 1), lambda b: (b, 0, 0))),
        scratch_shapes=[pltpu.VMEM((cin, hw), jnp.float32),
                        pltpu.VMEM((4 * cin, hw), jnp.float32)],
        compiler_params=_parallel_params(),
        cost_estimate=cost,
    )(x2r, upr, cond, colmask, wflat, bcol)


def conv_stage_fused_pallas(y_in, scale, shift, cond, colmask, wflat, bcol,
                            w_img):
    B, cin, hw = y_in.shape
    cout = wflat.shape[0]
    kernel = functools.partial(_stage_fused_kernel, w_img=w_img)
    cost = pl.CostEstimate(
        flops=2 * B * cout * 4 * cin * hw,
        transcendentals=0,
        bytes_accessed=4 * (B * cin * hw + B * cout * hw + cout * 4 * cin
                            + 2 * B * cout))
    return pl.pallas_call(
        kernel,
        out_shape=(jax.ShapeDtypeStruct((B, cout, hw), jnp.float32),
                   jax.ShapeDtypeStruct((B, cout, 1), jnp.float32),
                   jax.ShapeDtypeStruct((B, cout, 1), jnp.float32)),
        grid=(B,),
        in_specs=[pl.BlockSpec((None, cin, hw), lambda b: (b, 0, 0)),
                  pl.BlockSpec((cin, 1), lambda b: (0, 0)),
                  pl.BlockSpec((cin, 1), lambda b: (0, 0)),
                  pl.BlockSpec((None, cin, 1), lambda b: (b, 0, 0)),
                  pl.BlockSpec((1, hw), lambda b: (0, 0)),
                  pl.BlockSpec((cout, 4 * cin), lambda b: (0, 0)),
                  pl.BlockSpec((cout, 1), lambda b: (0, 0))],
        out_specs=(pl.BlockSpec((None, cout, hw), lambda b: (b, 0, 0)),
                   pl.BlockSpec((None, cout, 1), lambda b: (b, 0, 0)),
                   pl.BlockSpec((None, cout, 1), lambda b: (b, 0, 0))),
        scratch_shapes=[pltpu.VMEM((cin, hw), jnp.float32),
                        pltpu.VMEM((4 * cin, hw), jnp.float32)],
        compiler_params=_parallel_params(),
        cost_estimate=cost,
    )(y_in, scale, shift, cond, colmask, wflat, bcol)


def bn_relu_pallas(y, scale, shift):
    B, c, hw = y.shape
    return pl.pallas_call(
        _bn_relu_kernel,
        out_shape=jax.ShapeDtypeStruct((B, c, hw), jnp.float32),
        grid=(B,),
        in_specs=[pl.BlockSpec((None, c, hw), lambda b: (b, 0, 0)),
                  pl.BlockSpec((c, 1), lambda b: (0, 0)),
                  pl.BlockSpec((c, 1), lambda b: (0, 0))],
        out_specs=pl.BlockSpec((None, c, hw), lambda b: (b, 0, 0)),
        compiler_params=_parallel_params(),
    )(y, scale, shift)


# ------------------------------- JAX glue -----------------------------------

def preprocess_params(params):
    """One-time weight reshapes hoisted out of the forward pass."""
    up_w = params['up_w']                                  # (Cin, Cout, 2, 2)
    cin_up, cout = up_w.shape[0], up_w.shape[1]
    prep = dict(
        # rows ordered (di, dj, co) to match the sub-pixel tap layout
        up_w_all=jnp.transpose(up_w, (2, 3, 1, 0)).reshape(4 * cout, cin_up),
        up_b_all=jnp.tile(params['up_b'], (4,)).reshape(4 * cout, 1),
    )
    for name in ('b1', 'b2'):
        p = params[name]
        cw = p['conv_w']                                   # OIHW (Cout, Cin, 2, 2)
        co, ci = cw.shape[0], cw.shape[1]
        prep[name] = dict(
            mlp_wT=jnp.transpose(p['mlp_w']),              # (t_dim, Cin)
            mlp_b=p['mlp_b'],
            # columns ordered (di, dj, c) to match the in-kernel im2col rows
            w_flat=jnp.transpose(cw, (0, 2, 3, 1)).reshape(co, 4 * ci),
            b_col=p['conv_b'].reshape(co, 1),
            gamma=p['gamma'].reshape(co, 1),
            beta=p['beta'].reshape(co, 1),
        )
    return prep


def decode_block_forward(prep, x1_nchw, x2_nchw, time_emb):
    B, c1, h1, w1 = x1_nchw.shape
    _, c_skip, H, W = x2_nchw.shape
    hw = H * W
    cout = prep['up_w_all'].shape[0] // 4

    # NCHW is already channel-major; just flatten spatial onto the lane axis.
    x1r = x1_nchw.reshape(B, c1, h1 * w1)
    x2r = x2_nchw.reshape(B, c_skip, hw)

    # --- ConvTranspose2d(k=2, s=2): Pallas matmul producing the 4 taps; the
    #     cheap pixel-shuffle interleave stays in XLA (layout-only).
    up_taps = up_taps_pallas(x1r, prep['up_w_all'], prep['up_b_all'])
    up = up_taps.reshape(B, 2, 2, cout, h1, w1)
    up = jnp.transpose(up, (0, 3, 4, 1, 5, 2)).reshape(B, cout, H, W)
    upr = up.reshape(B, cout, hw)

    # right-edge mask for the dj=1 conv taps (1 everywhere except col == W-1)
    col = jnp.arange(hw, dtype=jnp.int32) % W
    colmask = (col != (W - 1)).astype(jnp.float32).reshape(1, hw)

    # tiny cond MLP (B x t_dim x C): left to XLA per review.
    t_act = jax.nn.gelu(time_emb, approximate=False)
    p1, p2 = prep['b1'], prep['b2']
    cond1 = (t_act @ p1['mlp_wT'] + p1['mlp_b']).reshape(B, -1, 1)
    cond2 = (t_act @ p2['mlp_wT'] + p2['mlp_b']).reshape(B, -1, 1)

    cnt = float(B * hw)

    def stats_to_affine(s_part, ss_part, gamma, beta):
        # global (batch) BatchNorm statistics from per-image partials
        total = jnp.sum(s_part, axis=0)                    # (C, 1)
        total_sq = jnp.sum(ss_part, axis=0)
        mean = total / cnt
        var = jnp.maximum(total_sq / cnt - mean * mean, 0.0)   # biased var
        inv = lax.rsqrt(var + _EPS)
        scale = gamma * inv
        shift = beta - mean * scale
        return scale, shift

    # --- conv block 1 (concat + cond fused in-kernel)
    y1, s1, ss1 = conv_stage1_pallas(x2r, upr, cond1, colmask,
                                     p1['w_flat'], p1['b_col'], W)
    sc1, sh1 = stats_to_affine(s1, ss1, p1['gamma'], p1['beta'])

    # --- conv block 2 (block-1 BN+ReLU fused into its input path)
    y2, s2, ss2 = conv_stage_fused_pallas(y1, sc1, sh1, cond2, colmask,
                                          p2['w_flat'], p2['b_col'], W)
    sc2, sh2 = stats_to_affine(s2, ss2, p2['gamma'], p2['beta'])

    # --- final BN + ReLU
    out = bn_relu_pallas(y2, sc2, sh2)                     # (B, Cout, H*W)
    return out.reshape(B, cout, H, W)                      # already NCHW


# --------------------------- pure-JAX reference ------------------------------

def reference_forward(params, x1, x2, time_emb):
    B, c1, h1, w1 = x1.shape
    w_up = params['up_w']                                  # (Cin, Cout, 2, 2)
    cout = w_up.shape[1]
    t = jnp.einsum('bcij,cokl->boikjl', x1, w_up)
    up = t.reshape(B, cout, 2 * h1, 2 * w1) + params['up_b'][None, :, None, None]
    x = jnp.concatenate([x2, up], axis=1)

    def block(xb, p):
        ta = jax.nn.gelu(time_emb, approximate=False)
        cond = ta @ p['mlp_w'].T + p['mlp_b']
        xc = xb + cond[:, :, None, None]
        y = lax.conv_general_dilated(
            xc, p['conv_w'], window_strides=(1, 1), padding=((0, 1), (0, 1)),
            dimension_numbers=('NCHW', 'OIHW', 'NCHW'))
        y = y + p['conv_b'][None, :, None, None]
        mean = jnp.mean(y, axis=(0, 2, 3), keepdims=True)
        var = jnp.mean(jnp.square(y - mean), axis=(0, 2, 3), keepdims=True)
        yh = (y - mean) * lax.rsqrt(var + _EPS)
        return jnp.maximum(p['gamma'][None, :, None, None] * yh
                           + p['beta'][None, :, None, None], 0.0)

    h = block(x, params['b1'])
    h = block(h, params['b2'])
    return h


# ---------------------------------- main -------------------------------------

def _init_block(key, cin, cout, t_dim):
    ks = jax.random.split(key, 6)
    return dict(
        mlp_w=0.2 * jax.random.normal(ks[0], (cin, t_dim), jnp.float32),
        mlp_b=0.1 * jax.random.normal(ks[1], (cin,), jnp.float32),
        conv_w=0.2 * jax.random.normal(ks[2], (cout, cin, 2, 2), jnp.float32),
        conv_b=0.1 * jax.random.normal(ks[3], (cout,), jnp.float32),
        gamma=1.0 + 0.1 * jax.random.normal(ks[4], (cout,), jnp.float32),
        beta=0.1 * jax.random.normal(ks[5], (cout,), jnp.float32),
    )


if __name__ == "__main__":
    in_ch, out_ch, t_dim = 8, 4, 32
    B, H1, W1 = 2, 8, 8                       # x1 spatial; after upsample -> 16x16

    key = jax.random.PRNGKey(0)
    k_up_w, k_up_b, k_b1, k_b2, k_x1, k_x2, k_t = jax.random.split(key, 7)

    params = dict(
        up_w=0.2 * jax.random.normal(k_up_w, (in_ch, out_ch, 2, 2), jnp.float32),
        up_b=0.1 * jax.random.normal(k_up_b, (out_ch,), jnp.float32),
        b1=_init_block(k_b1, in_ch, out_ch, t_dim),    # Conv_Block(in_ch -> out_ch)
        b2=_init_block(k_b2, out_ch, out_ch, t_dim),   # Conv_Block(out_ch -> out_ch)
    )

    x1 = jax.random.normal(k_x1, (B, in_ch, H1, W1), jnp.float32)              # NCHW
    x2 = jax.random.normal(k_x2, (B, in_ch - out_ch, 2 * H1, 2 * W1), jnp.float32)
    time_emb = jax.random.normal(k_t, (B, t_dim), jnp.float32)

    prep = preprocess_params(params)
    fwd = jax.jit(decode_block_forward)

    out = jax.block_until_ready(fwd(prep, x1, x2, time_emb))
    ref = jax.block_until_ready(reference_forward(params, x1, x2, time_emb))

    assert out.shape == (B, out_ch, 2 * H1, 2 * W1), out.shape
    max_err = float(jnp.max(jnp.abs(out - ref)))
    assert max_err < 1e-3, f"mismatch vs reference: {max_err}"
    print("KERNEL_OK")
</pallas_src>

<mosaic_0001>
module attributes {stable_mosaic.version = 11 : i64} {
  func.func @_up_taps_kernel(%arg0: i32, %arg1: memref<1x8x64xf32, #tpu.memory_space<vmem>>, %arg2: memref<16x8xf32, #tpu.memory_space<vmem>>, %arg3: memref<16x1xf32, #tpu.memory_space<vmem>>, %arg4: memref<1x16x64xf32, #tpu.memory_space<vmem>>) attributes {dimension_semantics = [#tpu.dimension_semantics<parallel>], iteration_bounds = array<i64: 2>, scalar_prefetch = 0 : i64, scratch_operands = 0 : i64, tpu.core_type = #tpu.core_type<tc>, window_params = [{transform_indices = @transform_0, window_bounds = array<i64: 1, 8, 64>}, {pipeline_mode = #tpu.pipeline_mode<synchronous>, transform_indices = @transform_1, window_bounds = array<i64: 16, 8>}, {pipeline_mode = #tpu.pipeline_mode<synchronous>, transform_indices = @transform_2, window_bounds = array<i64: 16, 1>}, {transform_indices = @transform_3, window_bounds = array<i64: 1, 16, 64>}]} {
    %c0 = arith.constant 0 : index
    %c0_0 = arith.constant 0 : index
    %0 = vector.load %arg2[%c0, %c0_0] : memref<16x8xf32, #tpu.memory_space<vmem>>, vector<16x8xf32>
    %c0_1 = arith.constant 0 : index
    %c0_2 = arith.constant 0 : index
    %c0_3 = arith.constant 0 : index
    %1 = vector.load %arg1[%c0_1, %c0_2, %c0_3] : memref<1x8x64xf32, #tpu.memory_space<vmem>>, vector<1x8x64xf32>
    %2 = vector.shape_cast %1 : vector<1x8x64xf32> to vector<8x64xf32>
    %cst = arith.constant dense<0.000000e+00> : vector<16x64xf32>
    %3 = tpu.matmul %0, %2, %cst {dimension_numbers = #tpu.dot_dimension_numbers<[1], [0], [0], [1], [0, 0, 1, 1], [], []>} : vector<16x8xf32>, vector<8x64xf32>, vector<16x64xf32> -> vector<16x64xf32>
    %c0_4 = arith.constant 0 : index
    %c0_5 = arith.constant 0 : index
    %4 = vector.load %arg3[%c0_4, %c0_5] : memref<16x1xf32, #tpu.memory_space<vmem>>, vector<16x1xf32>
    %5 = vector.broadcast %4 : vector<16x1xf32> to vector<16x64xf32>
    %6 = arith.addf %3, %5 : vector<16x64xf32>
    %c0_6 = arith.constant 0 : index
    %c0_7 = arith.constant 0 : index
    %c0_8 = arith.constant 0 : index
    %7 = vector.load %arg4[%c0_6, %c0_7, %c0_8] : memref<1x16x64xf32, #tpu.memory_space<vmem>>, vector<1x16x64xf32>
    %8 = vector.shape_cast %7 : vector<1x16x64xf32> to vector<16x64xf32>
    %9 = vector.shape_cast %6 : vector<16x64xf32> to vector<1x16x64xf32>
    tpu.vector_store %arg4[%c0_6, %c0_7, %c0_8], %9 {strides = array<i32>} : memref<1x16x64xf32, #tpu.memory_space<vmem>>, vector<1x16x64xf32>,
    return
  }
  func.func @transform_0(%arg0: i32) -> (i32, i32, i32) {
    %c0_i32 = arith.constant 0 : i32
    %c0_i32_0 = arith.constant 0 : i32
    %c0_i32_1 = arith.constant 0 : i32
    return %arg0, %c0_i32, %c0_i32_0 : i32, i32, i32
  }
  func.func @transform_1(%arg0: i32) -> (i32, i32) {
    %c0_i32 = arith.constant 0 : i32
    %c0_i32_0 = arith.constant 0 : i32
    %c0_i32_1 = arith.constant 0 : i32
    return %c0_i32, %c0_i32_0 : i32, i32
  }
  func.func @transform_2(%arg0: i32) -> (i32, i32) {
    %c0_i32 = arith.constant 0 : i32
    %c0_i32_0 = arith.constant 0 : i32
    %c0_i32_1 = arith.constant 0 : i32
    return %c0_i32, %c0_i32_0 : i32, i32
  }
  func.func @transform_3(%arg0: i32) -> (i32, i32, i32) {
    %c0_i32 = arith.constant 0 : i32
    %c0_i32_0 = arith.constant 0 : i32
    %c0_i32_1 = arith.constant 0 : i32
    return %arg0, %c0_i32, %c0_i32_0 : i32, i32, i32
  }
}

module attributes {stable_mosaic.version = 11 : i64} {
  func.func @_stage1_kernel(%arg0: i32, %arg1: memref<1x4x256xf32, #tpu.memory_space<vmem>>, %arg2: memref<1x4x256xf32, #tpu.memory_space<vmem>>, %arg3: memref<1x8x1xf32, #tpu.memory_space<vmem>>, %arg4: memref<1x256xf32, #tpu.memory_space<vmem>>, %arg5: memref<4x32xf32, #tpu.memory_space<vmem>>, %arg6: memref<4x1xf32, #tpu.memory_space<vmem>>, %arg7: memref<1x4x256xf32, #tpu.memory_space<vmem>>, %arg8: memref<1x4x1xf32, #tpu.memory_space<vmem>>, %arg9: memref<1x4x1xf32, #tpu.memory_space<vmem>>, %arg10: memref<8x256xf32, #tpu.memory_space<vmem>>, %arg11: memref<32x256xf32, #tpu.memory_space<vmem>>) attributes {dimension_semantics = [#tpu.dimension_semantics<parallel>], iteration_bounds = array<i64: 2>, scalar_prefetch = 0 : i64, scratch_operands = 2 : i64, tpu.core_type = #tpu.core_type<tc>, window_params = [{transform_indices = @transform_0, window_bounds = array<i64: 1, 4, 256>}, {transform_indices = @transform_1, window_bounds = array<i64: 1, 4, 256>}, {transform_indices = @transform_2, window_bounds = array<i64: 1, 8, 1>}, {pipeline_mode = #tpu.pipeline_mode<synchronous>, transform_indices = @transform_3, window_bounds = array<i64: 1, 256>}, {pipeline_mode = #tpu.pipeline_mode<synchronous>, transform_indices = @transform_4, window_bounds = array<i64: 4, 32>}, {pipeline_mode = #tpu.pipeline_mode<synchronous>, transform_indices = @transform_5, window_bounds = array<i64: 4, 1>}, {transform_indices = @transform_6, window_bounds = array<i64: 1, 4, 256>}, {transform_indices = @transform_7, window_bounds = array<i64: 1, 4, 1>}, {transform_indices = @transform_8, window_bounds = array<i64: 1, 4, 1>}]} {
    %c0 = arith.constant 0 : index
    %c0_0 = arith.constant 0 : index
    %c0_1 = arith.constant 0 : index
    %0 = vector.load %arg1[%c0, %c0_0, %c0_1] : memref<1x4x256xf32, #tpu.memory_space<vmem>>, vector<1x4x256xf32>
    %1 = vector.shape_cast %0 : vector<1x4x256xf32> to vector<4x256xf32>
    %c0_2 = arith.constant 0 : index
    %c0_3 = arith.constant 0 : index
    %c0_4 = arith.constant 0 : index
    %2 = vector.load %arg3[%c0_2, %c0_3, %c0_4] : memref<1x8x1xf32, #tpu.memory_space<vmem>>, vector<1x4x1xf32>
    %3 = vector.shape_cast %2 : vector<1x4x1xf32> to vector<4x1xf32>
    %4 = vector.broadcast %3 : vector<4x1xf32> to vector<4x256xf32>
    %5 = arith.addf %1, %4 : vector<4x256xf32>
    %c0_5 = arith.constant 0 : index
    %c0_6 = arith.constant 0 : index
    %6 = vector.load %arg10[%c0_5, %c0_6] : memref<8x256xf32, #tpu.memory_space<vmem>>, vector<4x256xf32>
    tpu.vector_store %arg10[%c0_5, %c0_6], %5 {strides = array<i32>} : memref<8x256xf32, #tpu.memory_space<vmem>>, vector<4x256xf32>,
    %c0_7 = arith.constant 0 : index
    %c0_8 = arith.constant 0 : index
    %c0_9 = arith.constant 0 : index
    %7 = vector.load %arg2[%c0_7, %c0_8, %c0_9] : memref<1x4x256xf32, #tpu.memory_space<vmem>>, vector<1x4x256xf32>
    %8 = vector.shape_cast %7 : vector<1x4x256xf32> to vector<4x256xf32>
    %c0_10 = arith.constant 0 : index
    %c4 = arith.constant 4 : index
    %c0_11 = arith.constant 0 : index
    %9 = vector.load %arg3[%c0_10, %c4, %c0_11] : memref<1x8x1xf32, #tpu.memory_space<vmem>>, vector<1x4x1xf32>
    %10 = vector.shape_cast %9 : vector<1x4x1xf32> to vector<4x1xf32>
    %11 = vector.broadcast %10 : vector<4x1xf32> to vector<4x256xf32>
    %12 = arith.addf %8, %11 : vector<4x256xf32>
    %c4_12 = arith.constant 4 : index
    %c0_13 = arith.constant 0 : index
    %13 = vector.load %arg10[%c4_12, %c0_13] : memref<8x256xf32, #tpu.memory_space<vmem>>, vector<4x256xf32>
    tpu.vector_store %arg10[%c4_12, %c0_13], %12 {strides = array<i32>} : memref<8x256xf32, #tpu.memory_space<vmem>>, vector<4x256xf32>,
    %cst = arith.constant 0.000000e+00 : f32
    %14 = vector.broadcast %cst : f32 to vector<32x256xf32>
    %c0_14 = arith.constant 0 : index
    %c0_15 = arith.constant 0 : index
    %15 = vector.load %arg11[%c0_14, %c0_15] : memref<32x256xf32, #tpu.memory_space<vmem>>, vector<32x256xf32>
    tpu.vector_store %arg11[%c0_14, %c0_15], %14 {strides = array<i32>} : memref<32x256xf32, #tpu.memory_space<vmem>>, vector<32x256xf32>,
    %c0_16 = arith.constant 0 : index
    %c0_17 = arith.constant 0 : index
    %16 = vector.load %arg10[%c0_16, %c0_17] : memref<8x256xf32, #tpu.memory_space<vmem>>, vector<8x256xf32>
    %c0_18 = arith.constant 0 : index
    %c0_19 = arith.constant 0 : index
    %17 = vector.load %arg11[%c0_18, %c0_19] : memref<32x256xf32, #tpu.memory_space<vmem>>, vector<8x256xf32>
    tpu.vector_store %arg11[%c0_18, %c0_19], %16 {strides = array<i32>} : memref<32x256xf32, #tpu.memory_space<vmem>>, vector<8x256xf32>,
    %c0_20 = arith.constant 0 : index
    %c1 = arith.constant 1 : index
    %18 = vector.load %arg10[%c0_20, %c1] : memref<8x256xf32, #tpu.memory_space<vmem>>, vector<8x255xf32>
    %c0_21 = arith.constant 0 : index
    %c0_22 = arith.constant 0 : index
    %19 = vector.load %arg4[%c0_21, %c0_22] : memref<1x256xf32, #tpu.memory_space<vmem>>, vector<1x255xf32>
    %20 = vector.broadcast %19 : vector<1x255xf32> to vector<8x255xf32>
    %21 = arith.mulf %18, %20 : vector<8x255xf32>
    %c8 = arith.constant 8 : index
    %c0_23 = arith.constant 0 : index
    %22 = vector.load %arg11[%c8, %c0_23] : memref<32x256xf32, #tpu.memory_space<vmem>>, vector<8x255xf32>
    tpu.vector_store %arg11[%c8, %c0_23], %21 {strides = array<i32>} : memref<32x256xf32, #tpu.memory_space<vmem>>, vector<8x255xf32>,
    %c0_24 = arith.constant 0 : index
    %c16 = arith.constant 16 : index
    %23 = vector.load %arg10[%c0_24, %c16] : memref<8x256xf32, #tpu.memory_space<vmem>>, vector<8x240xf32>
    %c16_25 = arith.constant 16 : index
    %c0_26 = arith.constant 0 : index
    %24 = vector.load %arg11[%c16_25, %c0_26] : memref<32x256xf32, #tpu.memory_space<vmem>>, vector<8x240xf32>
    tpu.vector_store %arg11[%c16_25, %c0_26], %23 {strides = array<i32>} : memref<32x256xf32, #tpu.memory_space<vmem>>, vector<8x240xf32>,
    %c0_27 = arith.constant 0 : index
    %c17 = arith.constant 17 : index
    %25 = vector.load %arg10[%c0_27, %c17] : memref<8x256xf32, #tpu.memory_space<vmem>>, vector<8x239xf32>
    %c0_28 = arith.constant 0 : index
    %c0_29 = arith.constant 0 : index
    %26 = vector.load %arg4[%c0_28, %c0_29] : memref<1x256xf32, #tpu.memory_space<vmem>>, vector<1x239xf32>
    %27 = vector.broadcast %26 : vector<1x239xf32> to vector<8x239xf32>
    %28 = arith.mulf %25, %27 : vector<8x239xf32>
    %c24 = arith.constant 24 : index
    %c0_30 = arith.constant 0 : index
    %29 = vector.load %arg11[%c24, %c0_30] : memref<32x256xf32, #tpu.memory_space<vmem>>, vector<8x239xf32>
    tpu.vector_store %arg11[%c24, %c0_30], %28 {strides = array<i32>} : memref<32x256xf32, #tpu.memory_space<vmem>>, vector<8x239xf32>,
    %c0_31 = arith.constant 0 : index
    %c0_32 = arith.constant 0 : index
    %30 = vector.load %arg5[%c0_31, %c0_32] : memref<4x32xf32, #tpu.memory_space<vmem>>, vector<4x32xf32>
    %c0_33 = arith.constant 0 : index
    %c0_34 = arith.constant 0 : index
    %31 = vector.load %arg11[%c0_33, %c0_34] : memref<32x256xf32, #tpu.memory_space<vmem>>, vector<32x256xf32>
    %cst_35 = arith.constant dense<0.000000e+00> : vector<4x256xf32>
    %32 = tpu.matmul %30, %31, %cst_35 {dimension_numbers = #tpu.dot_dimension_numbers<[1], [0], [0], [1], [0, 0, 1, 1], [], []>} : vector<4x32xf32>, vector<32x256xf32>, vector<4x256xf32> -> vector<4x256xf32>
    %c0_36 = arith.constant 0 : index
    %c0_37 = arith.constant 0 : index
    %33 = vector.load %arg6[%c0_36, %c0_37] : memref<4x1xf32, #tpu.memory_space<vmem>>, vector<4x1xf32>
    %34 = vector.broadcast %33 : vector<4x1xf32> to vector<4x256xf32>
    %35 = arith.addf %32, %34 : vector<4x256xf32>
    %c0_38 = arith.constant 0 : index
    %c0_39 = arith.constant 0 : index
    %c0_40 = arith.constant 0 : index
    %36 = vector.load %arg7[%c0_38, %c0_39, %c0_40] : memref<1x4x256xf32, #tpu.memory_space<vmem>>, vector<1x4x256xf32>
    %37 = vector.shape_cast %36 : vector<1x4x256xf32> to vector<4x256xf32>
    %38 = vector.shape_cast %35 : vector<4x256xf32> to vector<1x4x256xf32>
    tpu.vector_store %arg7[%c0_38, %c0_39, %c0_40], %38 {strides = array<i32>} : memref<1x4x256xf32, #tpu.memory_space<vmem>>, vector<1x4x256xf32>,
    %cst_41 = arith.constant dense<0.000000e+00> : vector<4xf32>
    %39 = vector.multi_reduction <add>, %35, %cst_41 [1] : vector<4x256xf32> to vector<4xf32>
    %40 = vector.shape_cast %39 : vector<4xf32> to vector<4x1xf32>
    %c0_42 = arith.constant 0 : index
    %c0_43 = arith.constant 0 : index
    %c0_44 = arith.constant 0 : index
    %41 = vector.load %arg8[%c0_42, %c0_43, %c0_44] : memref<1x4x1xf32, #tpu.memory_space<vmem>>, vector<1x4x1xf32>
    %42 = vector.shape_cast %41 : vector<1x4x1xf32> to vector<4x1xf32>
    %43 = vector.shape_cast %40 : vector<4x1xf32> to vector<1x4x1xf32>
    tpu.vector_store %arg8[%c0_42, %c0_43, %c0_44], %43 {strides = array<i32>} : memref<1x4x1xf32, #tpu.memory_space<vmem>>, vector<1x4x1xf32>,
    %44 = arith.mulf %35, %35 : vector<4x256xf32>
    %cst_45 = arith.constant dense<0.000000e+00> : vector<4xf32>
    %45 = vector.multi_reduction <add>, %44, %cst_45 [1] : vector<4x256xf32> to vector<4xf32>
    %46 = vector.shape_cast %45 : vector<4xf32> to vector<4x1xf32>
    %c0_46 = arith.constant 0 : index
    %c0_47 = arith.constant 0 : index
    %c0_48 = arith.constant 0 : index
    %47 = vector.load %arg9[%c0_46, %c0_47, %c0_48] : memref<1x4x1xf32, #tpu.memory_space<vmem>>, vector<1x4x1xf32>
    %48 = vector.shape_cast %47 : vector<1x4x1xf32> to vector<4x1xf32>
    %49 = vector.shape_cast %46 : vector<4x1xf32> to vector<1x4x1xf32>
    tpu.vector_store %arg9[%c0_46, %c0_47, %c0_48], %49 {strides = array<i32>} : memref<1x4x1xf32, #tpu.memory_space<vmem>>, vector<1x4x1xf32>,
    return
  }
  func.func @transform_0(%arg0: i32) -> (i32, i32, i32) {
    %c0_i32 = arith.constant 0 : i32
    %c0_i32_0 = arith.constant 0 : i32
    %c0_i32_1 = arith.constant 0 : i32
    return %arg0, %c0_i32, %c0_i32_0 : i32, i32, i32
  }
  func.func @transform_1(%arg0: i32) -> (i32, i32, i32) {
    %c0_i32 = arith.constant 0 : i32
    %c0_i32_0 = arith.constant 0 : i32
    %c0_i32_1 = arith.constant 0 : i32
    return %arg0, %c0_i32, %c0_i32_0 : i32, i32, i32
  }
  func.func @transform_2(%arg0: i32) -> (i32, i32, i32) {
    %c0_i32 = arith.constant 0 : i32
    %c0_i32_0 = arith.constant 0 : i32
    %c0_i32_1 = arith.constant 0 : i32
    return %arg0, %c0_i32, %c0_i32_0 : i32, i32, i32
  }
  func.func @transform_3(%arg0: i32) -> (i32, i32) {
    %c0_i32 = arith.constant 0 : i32
    %c0_i32_0 = arith.constant 0 : i32
    %c0_i32_1 = arith.constant 0 : i32
    return %c0_i32, %c0_i32_0 : i32, i32
  }
  func.func @transform_4(%arg0: i32) -> (i32, i32) {
    %c0_i32 = arith.constant 0 : i32
    %c0_i32_0 = arith.constant 0 : i32
    %c0_i32_1 = arith.constant 0 : i32
    return %c0_i32, %c0_i32_0 : i32, i32
  }
  func.func @transform_5(%arg0: i32) -> (i32, i32) {
    %c0_i32 = arith.constant 0 : i32
    %c0_i32_0 = arith.constant 0 : i32
    %c0_i32_1 = arith.constant 0 : i32
    return %c0_i32, %c0_i32_0 : i32, i32
  }
  func.func @transform_6(%arg0: i32) -> (i32, i32, i32) {
    %c0_i32 = arith.constant 0 : i32
    %c0_i32_0 = arith.constant 0 : i32
    %c0_i32_1 = arith.constant 0 : i32
    return %arg0, %c0_i32, %c0_i32_0 : i32, i32, i32
  }
  func.func @transform_7(%arg0: i32) -> (i32, i32, i32) {
    %c0_i32 = arith.constant 0 : i32
    %c0_i32_0 = arith.constant 0 : i32
    %c0_i32_1 = arith.constant 0 : i32
    return %arg0, %c0_i32, %c0_i32_0 : i32, i32, i32
  }
  func.func @transform_8(%arg0: i32) -> (i32, i32, i32) {
    %c0_i32 = arith.constant 0 : i32
    %c0_i32_0 = arith.constant 0 : i32
    %c0_i32_1 = arith.constant 0 : i32
    return %arg0, %c0_i32, %c0_i32_0 : i32, i32, i32
  }
}

module attributes {stable_mosaic.version = 11 : i64} {
  func.func @_stage_fused_kernel(%arg0: i32, %arg1: memref<1x4x256xf32, #tpu.memory_space<vmem>>, %arg2: memref<4x1xf32, #tpu.memory_space<vmem>>, %arg3: memref<4x1xf32, #tpu.memory_space<vmem>>, %arg4: memref<1x4x1xf32, #tpu.memory_space<vmem>>, %arg5: memref<1x256xf32, #tpu.memory_space<vmem>>, %arg6: memref<4x16xf32, #tpu.memory_space<vmem>>, %arg7: memref<4x1xf32, #tpu.memory_space<vmem>>, %arg8: memref<1x4x256xf32, #tpu.memory_space<vmem>>, %arg9: memref<1x4x1xf32, #tpu.memory_space<vmem>>, %arg10: memref<1x4x1xf32, #tpu.memory_space<vmem>>, %arg11: memref<4x256xf32, #tpu.memory_space<vmem>>, %arg12: memref<16x256xf32, #tpu.memory_space<vmem>>) attributes {dimension_semantics = [#tpu.dimension_semantics<parallel>], iteration_bounds = array<i64: 2>, scalar_prefetch = 0 : i64, scratch_operands = 2 : i64, tpu.core_type = #tpu.core_type<tc>, window_params = [{transform_indices = @transform_0, window_bounds = array<i64: 1, 4, 256>}, {pipeline_mode = #tpu.pipeline_mode<synchronous>, transform_indices = @transform_1, window_bounds = array<i64: 4, 1>}, {pipeline_mode = #tpu.pipeline_mode<synchronous>, transform_indices = @transform_2, window_bounds = array<i64: 4, 1>}, {transform_indices = @transform_3, window_bounds = array<i64: 1, 4, 1>}, {pipeline_mode = #tpu.pipeline_mode<synchronous>, transform_indices = @transform_4, window_bounds = array<i64: 1, 256>}, {pipeline_mode = #tpu.pipeline_mode<synchronous>, transform_indices = @transform_5, window_bounds = array<i64: 4, 16>}, {pipeline_mode = #tpu.pipeline_mode<synchronous>, transform_indices = @transform_6, window_bounds = array<i64: 4, 1>}, {transform_indices = @transform_7, window_bounds = array<i64: 1, 4, 256>}, {transform_indices = @transform_8, window_bounds = array<i64: 1, 4, 1>}, {transform_indices = @transform_9, window_bounds = array<i64: 1, 4, 1>}]} {
    %c0 = arith.constant 0 : index
    %c0_0 = arith.constant 0 : index
    %0 = vector.load %arg2[%c0, %c0_0] : memref<4x1xf32, #tpu.memory_space<vmem>>, vector<4x1xf32>
    %c0_1 = arith.constant 0 : index
    %c0_2 = arith.constant 0 : index
    %c0_3 = arith.constant 0 : index
    %1 = vector.load %arg1[%c0_1, %c0_2, %c0_3] : memref<1x4x256xf32, #tpu.memory_space<vmem>>, vector<1x4x256xf32>
    %2 = vector.shape_cast %1 : vector<1x4x256xf32> to vector<4x256xf32>
    %3 = vector.broadcast %0 : vector<4x1xf32> to vector<4x256xf32>
    %4 = arith.mulf %3, %2 : vector<4x256xf32>
    %c0_4 = arith.constant 0 : index
    %c0_5 = arith.constant 0 : index
    %5 = vector.load %arg3[%c0_4, %c0_5] : memref<4x1xf32, #tpu.memory_space<vmem>>, vector<4x1xf32>
    %6 = vector.broadcast %5 : vector<4x1xf32> to vector<4x256xf32>
    %7 = arith.addf %4, %6 : vector<4x256xf32>
    %cst = arith.constant 0.000000e+00 : f32
    %8 = vector.broadcast %cst : f32 to vector<4x256xf32>
    %9 = arith.maximumf %7, %8 : vector<4x256xf32>
    %c0_6 = arith.constant 0 : index
    %c0_7 = arith.constant 0 : index
    %c0_8 = arith.constant 0 : index
    %10 = vector.load %arg4[%c0_6, %c0_7, %c0_8] : memref<1x4x1xf32, #tpu.memory_space<vmem>>, vector<1x4x1xf32>
    %11 = vector.shape_cast %10 : vector<1x4x1xf32> to vector<4x1xf32>
    %12 = vector.broadcast %11 : vector<4x1xf32> to vector<4x256xf32>
    %13 = arith.addf %9, %12 : vector<4x256xf32>
    %c0_9 = arith.constant 0 : index
    %c0_10 = arith.constant 0 : index
    %14 = vector.load %arg11[%c0_9, %c0_10] : memref<4x256xf32, #tpu.memory_space<vmem>>, vector<4x256xf32>
    tpu.vector_store %arg11[%c0_9, %c0_10], %13 {strides = array<i32>} : memref<4x256xf32, #tpu.memory_space<vmem>>, vector<4x256xf32>,
    %cst_11 = arith.constant 0.000000e+00 : f32
    %15 = vector.broadcast %cst_11 : f32 to vector<16x256xf32>
    %c0_12 = arith.constant 0 : index
    %c0_13 = arith.constant 0 : index
    %16 = vector.load %arg12[%c0_12, %c0_13] : memref<16x256xf32, #tpu.memory_space<vmem>>, vector<16x256xf32>
    tpu.vector_store %arg12[%c0_12, %c0_13], %15 {strides = array<i32>} : memref<16x256xf32, #tpu.memory_space<vmem>>, vector<16x256xf32>,
    %c0_14 = arith.constant 0 : index
    %c0_15 = arith.constant 0 : index
    %17 = vector.load %arg11[%c0_14, %c0_15] : memref<4x256xf32, #tpu.memory_space<vmem>>, vector<4x256xf32>
    %c0_16 = arith.constant 0 : index
    %c0_17 = arith.constant 0 : index
    %18 = vector.load %arg12[%c0_16, %c0_17] : memref<16x256xf32, #tpu.memory_space<vmem>>, vector<4x256xf32>
    tpu.vector_store %arg12[%c0_16, %c0_17], %17 {strides = array<i32>} : memref<16x256xf32, #tpu.memory_space<vmem>>, vector<4x256xf32>,
    %c0_18 = arith.constant 0 : index
    %c1 = arith.constant 1 : index
    %19 = vector.load %arg11[%c0_18, %c1] : memref<4x256xf32, #tpu.memory_space<vmem>>, vector<4x255xf32>
    %c0_19 = arith.constant 0 : index
    %c0_20 = arith.constant 0 : index
    %20 = vector.load %arg5[%c0_19, %c0_20] : memref<1x256xf32, #tpu.memory_space<vmem>>, vector<1x255xf32>
    %21 = vector.broadcast %20 : vector<1x255xf32> to vector<4x255xf32>
    %22 = arith.mulf %19, %21 : vector<4x255xf32>
    %c4 = arith.constant 4 : index
    %c0_21 = arith.constant 0 : index
    %23 = vector.load %arg12[%c4, %c0_21] : memref<16x256xf32, #tpu.memory_space<vmem>>, vector<4x255xf32>
    tpu.vector_store %arg12[%c4, %c0_21], %22 {strides = array<i32>} : memref<16x256xf32, #tpu.memory_space<vmem>>, vector<4x255xf32>,
    %c0_22 = arith.constant 0 : index
    %c16 = arith.constant 16 : index
    %24 = vector.load %arg11[%c0_22, %c16] : memref<4x256xf32, #tpu.memory_space<vmem>>, vector<4x240xf32>
    %c8 = arith.constant 8 : index
    %c0_23 = arith.constant 0 : index
    %25 = vector.load %arg12[%c8, %c0_23] : memref<16x256xf32, #tpu.memory_space<vmem>>, vector<4x240xf32>
    tpu.vector_store %arg12[%c8, %c0_23], %24 {strides = array<i32>} : memref<16x256xf32, #tpu.memory_space<vmem>>, vector<4x240xf32>,
    %c0_24 = arith.constant 0 : index
    %c17 = arith.constant 17 : index
    %26 = vector.load %arg11[%c0_24, %c17] : memref<4x256xf32, #tpu.memory_space<vmem>>, vector<4x239xf32>
    %c0_25 = arith.constant 0 : index
    %c0_26 = arith.constant 0 : index
    %27 = vector.load %arg5[%c0_25, %c0_26] : memref<1x256xf32, #tpu.memory_space<vmem>>, vector<1x239xf32>
    %28 = vector.broadcast %27 : vector<1x239xf32> to vector<4x239xf32>
    %29 = arith.mulf %26, %28 : vector<4x239xf32>
    %c12 = arith.constant 12 : index
    %c0_27 = arith.constant 0 : index
    %30 = vector.load %arg12[%c12, %c0_27] : memref<16x256xf32, #tpu.memory_space<vmem>>, vector<4x239xf32>
    tpu.vector_store %arg12[%c12, %c0_27], %29 {strides = array<i32>} : memref<16x256xf32, #tpu.memory_space<vmem>>, vector<4x239xf32>,
    %c0_28 = arith.constant 0 : index
    %c0_29 = arith.constant 0 : index
    %31 = vector.load %arg6[%c0_28, %c0_29] : memref<4x16xf32, #tpu.memory_space<vmem>>, vector<4x16xf32>
    %c0_30 = arith.constant 0 : index
    %c0_31 = arith.constant 0 : index
    %32 = vector.load %arg12[%c0_30, %c0_31] : memref<16x256xf32, #tpu.memory_space<vmem>>, vector<16x256xf32>
    %cst_32 = arith.constant dense<0.000000e+00> : vector<4x256xf32>
    %33 = tpu.matmul %31, %32, %cst_32 {dimension_numbers = #tpu.dot_dimension_numbers<[1], [0], [0], [1], [0, 0, 1, 1], [], []>} : vector<4x16xf32>, vector<16x256xf32>, vector<4x256xf32> -> vector<4x256xf32>
    %c0_33 = arith.constant 0 : index
    %c0_34 = arith.constant 0 : index
    %34 = vector.load %arg7[%c0_33, %c0_34] : memref<4x1xf32, #tpu.memory_space<vmem>>, vector<4x1xf32>
    %35 = vector.broadcast %34 : vector<4x1xf32> to vector<4x256xf32>
    %36 = arith.addf %33, %35 : vector<4x256xf32>
    %c0_35 = arith.constant 0 : index
    %c0_36 = arith.constant 0 : index
    %c0_37 = arith.constant 0 : index
    %37 = vector.load %arg8[%c0_35, %c0_36, %c0_37] : memref<1x4x256xf32, #tpu.memory_space<vmem>>, vector<1x4x256xf32>
    %38 = vector.shape_cast %37 : vector<1x4x256xf32> to vector<4x256xf32>
    %39 = vector.shape_cast %36 : vector<4x256xf32> to vector<1x4x256xf32>
    tpu.vector_store %arg8[%c0_35, %c0_36, %c0_37], %39 {strides = array<i32>} : memref<1x4x256xf32, #tpu.memory_space<vmem>>, vector<1x4x256xf32>,
    %cst_38 = arith.constant dense<0.000000e+00> : vector<4xf32>
    %40 = vector.multi_reduction <add>, %36, %cst_38 [1] : vector<4x256xf32> to vector<4xf32>
    %41 = vector.shape_cast %40 : vector<4xf32> to vector<4x1xf32>
    %c0_39 = arith.constant 0 : index
    %c0_40 = arith.constant 0 : index
    %c0_41 = arith.constant 0 : index
    %42 = vector.load %arg9[%c0_39, %c0_40, %c0_41] : memref<1x4x1xf32, #tpu.memory_space<vmem>>, vector<1x4x1xf32>
    %43 = vector.shape_cast %42 : vector<1x4x1xf32> to vector<4x1xf32>
    %44 = vector.shape_cast %41 : vector<4x1xf32> to vector<1x4x1xf32>
    tpu.vector_store %arg9[%c0_39, %c0_40, %c0_41], %44 {strides = array<i32>} : memref<1x4x1xf32, #tpu.memory_space<vmem>>, vector<1x4x1xf32>,
    %45 = arith.mulf %36, %36 : vector<4x256xf32>
    %cst_42 = arith.constant dense<0.000000e+00> : vector<4xf32>
    %46 = vector.multi_reduction <add>, %45, %cst_42 [1] : vector<4x256xf32> to vector<4xf32>
    %47 = vector.shape_cast %46 : vector<4xf32> to vector<4x1xf32>
    %c0_43 = arith.constant 0 : index
    %c0_44 = arith.constant 0 : index
    %c0_45 = arith.constant 0 : index
    %48 = vector.load %arg10[%c0_43, %c0_44, %c0_45] : memref<1x4x1xf32, #tpu.memory_space<vmem>>, vector<1x4x1xf32>
    %49 = vector.shape_cast %48 : vector<1x4x1xf32> to vector<4x1xf32>
    %50 = vector.shape_cast %47 : vector<4x1xf32> to vector<1x4x1xf32>
    tpu.vector_store %arg10[%c0_43, %c0_44, %c0_45], %50 {strides = array<i32>} : memref<1x4x1xf32, #tpu.memory_space<vmem>>, vector<1x4x1xf32>,
    return
  }
  func.func @transform_0(%arg0: i32) -> (i32, i32, i32) {
    %c0_i32 = arith.constant 0 : i32
    %c0_i32_0 = arith.constant 0 : i32
    %c0_i32_1 = arith.constant 0 : i32
    return %arg0, %c0_i32, %c0_i32_0 : i32, i32, i32
  }
  func.func @transform_1(%arg0: i32) -> (i32, i32) {
    %c0_i32 = arith.constant 0 : i32
    %c0_i32_0 = arith.constant 0 : i32
    %c0_i32_1 = arith.constant 0 : i32
    return %c0_i32, %c0_i32_0 : i32, i32
  }
  func.func @transform_2(%arg0: i32) -> (i32, i32) {
    %c0_i32 = arith.constant 0 : i32
    %c0_i32_0 = arith.constant 0 : i32
    %c0_i32_1 = arith.constant 0 : i32
    return %c0_i32, %c0_i32_0 : i32, i32
  }
  func.func @transform_3(%arg0: i32) -> (i32, i32, i32) {
    %c0_i32 = arith.constant 0 : i32
    %c0_i32_0 = arith.constant 0 : i32
    %c0_i32_1 = arith.constant 0 : i32
    return %arg0, %c0_i32, %c0_i32_0 : i32, i32, i32
  }
  func.func @transform_4(%arg0: i32) -> (i32, i32) {
    %c0_i32 = arith.constant 0 : i32
    %c0_i32_0 = arith.constant 0 : i32
    %c0_i32_1 = arith.constant 0 : i32
    return %c0_i32, %c0_i32_0 : i32, i32
  }
  func.func @transform_5(%arg0: i32) -> (i32, i32) {
    %c0_i32 = arith.constant 0 : i32
    %c0_i32_0 = arith.constant 0 : i32
    %c0_i32_1 = arith.constant 0 : i32
    return %c0_i32, %c0_i32_0 : i32, i32
  }
  func.func @transform_6(%arg0: i32) -> (i32, i32) {
    %c0_i32 = arith.constant 0 : i32
    %c0_i32_0 = arith.constant 0 : i32
    %c0_i32_1 = arith.constant 0 : i32
    return %c0_i32, %c0_i32_0 : i32, i32
  }
  func.func @transform_7(%arg0: i32) -> (i32, i32, i32) {
    %c0_i32 = arith.constant 0 : i32
    %c0_i32_0 = arith.constant 0 : i32
    %c0_i32_1 = arith.constant 0 : i32
    return %arg0, %c0_i32, %c0_i32_0 : i32, i32, i32
  }
  func.func @transform_8(%arg0: i32) -> (i32, i32, i32) {
    %c0_i32 = arith.constant 0 : i32
    %c0_i32_0 = arith.constant 0 : i32
    %c0_i32_1 = arith.constant 0 : i32
    return %arg0, %c0_i32, %c0_i32_0 : i32, i32, i32
  }
  func.func @transform_9(%arg0: i32) -> (i32, i32, i32) {
    %c0_i32 = arith.constant 0 : i32
    %c0_i32_0 = arith.constant 0 : i32
    %c0_i32_1 = arith.constant 0 : i32
    return %arg0, %c0_i32, %c0_i32_0 : i32, i32, i32
  }
}

module attributes {stable_mosaic.version = 11 : i64} {
  func.func @_bn_relu_kernel(%arg0: i32, %arg1: memref<1x4x256xf32, #tpu.memory_space<vmem>>, %arg2: memref<4x1xf32, #tpu.memory_space<vmem>>, %arg3: memref<4x1xf32, #tpu.memory_space<vmem>>, %arg4: memref<1x4x256xf32, #tpu.memory_space<vmem>>) attributes {dimension_semantics = [#tpu.dimension_semantics<parallel>], iteration_bounds = array<i64: 2>, scalar_prefetch = 0 : i64, scratch_operands = 0 : i64, tpu.core_type = #tpu.core_type<tc>, window_params = [{transform_indices = @transform_0, window_bounds = array<i64: 1, 4, 256>}, {pipeline_mode = #tpu.pipeline_mode<synchronous>, transform_indices = @transform_1, window_bounds = array<i64: 4, 1>}, {pipeline_mode = #tpu.pipeline_mode<synchronous>, transform_indices = @transform_2, window_bounds = array<i64: 4, 1>}, {transform_indices = @transform_3, window_bounds = array<i64: 1, 4, 256>}]} {
    %c0 = arith.constant 0 : index
    %c0_0 = arith.constant 0 : index
    %0 = vector.load %arg2[%c0, %c0_0] : memref<4x1xf32, #tpu.memory_space<vmem>>, vector<4x1xf32>
    %c0_1 = arith.constant 0 : index
    %c0_2 = arith.constant 0 : index
    %c0_3 = arith.constant 0 : index
    %1 = vector.load %arg1[%c0_1, %c0_2, %c0_3] : memref<1x4x256xf32, #tpu.memory_space<vmem>>, vector<1x4x256xf32>
    %2 = vector.shape_cast %1 : vector<1x4x256xf32> to vector<4x256xf32>
    %3 = vector.broadcast %0 : vector<4x1xf32> to vector<4x256xf32>
    %4 = arith.mulf %3, %2 : vector<4x256xf32>
    %c0_4 = arith.constant 0 : index
    %c0_5 = arith.constant 0 : index
    %5 = vector.load %arg3[%c0_4, %c0_5] : memref<4x1xf32, #tpu.memory_space<vmem>>, vector<4x1xf32>
    %6 = vector.broadcast %5 : vector<4x1xf32> to vector<4x256xf32>
    %7 = arith.addf %4, %6 : vector<4x256xf32>
    %cst = arith.constant 0.000000e+00 : f32
    %8 = vector.broadcast %cst : f32 to vector<4x256xf32>
    %9 = arith.maximumf %7, %8 : vector<4x256xf32>
    %c0_6 = arith.constant 0 : index
    %c0_7 = arith.constant 0 : index
    %c0_8 = arith.constant 0 : index
    %10 = vector.load %arg4[%c0_6, %c0_7, %c0_8] : memref<1x4x256xf32, #tpu.memory_space<vmem>>, vector<1x4x256xf32>
    %11 = vector.shape_cast %10 : vector<1x4x256xf32> to vector<4x256xf32>
    %12 = vector.shape_cast %9 : vector<4x256xf32> to vector<1x4x256xf32>
    tpu.vector_store %arg4[%c0_6, %c0_7, %c0_8], %12 {strides = array<i32>} : memref<1x4x256xf32, #tpu.memory_space<vmem>>, vector<1x4x256xf32>,
    return
  }
  func.func @transform_0(%arg0: i32) -> (i32, i32, i32) {
    %c0_i32 = arith.constant 0 : i32
    %c0_i32_0 = arith.constant 0 : i32
    %c0_i32_1 = arith.constant 0 : i32
    return %arg0, %c0_i32, %c0_i32_0 : i32, i32, i32
  }
  func.func @transform_1(%arg0: i32) -> (i32, i32) {
    %c0_i32 = arith.constant 0 : i32
    %c0_i32_0 = arith.constant 0 : i32
    %c0_i32_1 = arith.constant 0 : i32
    return %c0_i32, %c0_i32_0 : i32, i32
  }
  func.func @transform_2(%arg0: i32) -> (i32, i32) {
    %c0_i32 = arith.constant 0 : i32
    %c0_i32_0 = arith.constant 0 : i32
    %c0_i32_1 = arith.constant 0 : i32
    return %c0_i32, %c0_i32_0 : i32, i32
  }
  func.func @transform_3(%arg0: i32) -> (i32, i32, i32) {
    %c0_i32 = arith.constant 0 : i32
    %c0_i32_0 = arith.constant 0 : i32
    %c0_i32_1 = arith.constant 0 : i32
    return %arg0, %c0_i32, %c0_i32_0 : i32, i32, i32
  }
}

</mosaic_0001>

<bundles_post_ra>
// kernel: decode_block_forward.4
= control target key start
LH: loop header
LB: loop body
LE: loop exit
PB: predicated region body
PF: predicated region fallthrough
CT: control target
= control target key end

     0   :  { %s383_s12 = smov 0   ;;  %s412_s0 = inlined_call_operand.vmem [shape: f32[2,8,64], index: 0, kind: input, shape index: {}]   ;;  %s413_s1 = inlined_call_operand.vmem [shape: f32[16,8], index: 1, kind: input, shape index: {}]   ;;  %s414_s2 = inlined_call_operand.vmem [shape: f32[16,1], index: 2, kind: input, shape index: {}]   ;;  %s415_s3 = inlined_call_operand.vmem [shape: f32[2,16,64], index: 3, kind: output, shape index: {}]  }
   0x1 LB: > { %s323_s13 = sadd.s32 4294967295, %s360_s12   ;;  %p327_p0 = scmp.ge.s32.totalorder %s360_s12, 1  ;;  %s360_s12 = sphi %s383_s12, %s13_s12  }
   0x2   : > { %p136_p1 = scmp.lt.s32.totalorder %s360_s12, 3 }
   0x4   : > { %p137_p2 = pnand %p327_p0, %p136_p1 }
   0x5   : > { %p159_p3 = scmp.lt.s32.totalorder (!%p137_p2), %s323_s13, 1  ;;  %v168_v0 = vld [vmem:[%s413_s1] sm:$0xff] (!%p137_p2)  ;;  %vm183_vm0 = vcmask (!%p137_p2), 64512   ;;  %v362_v2 = vmov (!%p137_p2), 0   ;;  %v172_v3 = vld [vmem:[%s414_s2 + $0x8] sm:$0xff] (!%p137_p2)  ;;  %vm265_vm1 = vcmask (!%p137_p2), 523264  }
   0x6   : > { %140 = sbr.rel (%p137_p2) target bundleno = 235 (0xeb), region = 32  ;;  %v171_v1 = vld [vmem:[%s414_s2] sm:$0xff] (!%p137_p2)  ;;  %341 = vmatprep.mubr.msk.f32.mxu0 (!%p137_p2), %vm183_vm0, %v168_v0  ;;  %353 = vset.pattern.permute.xlu0 (!%p137_p2), %v362_v2  ;;  %v169_v5 = vld [vmem:[%s413_s1 + $0x8] sm:$0xff] (!%p137_p2) }
   0x7   : > { %175 = vperm.xlu0 (!%p137_p2), %353, %v171_v1  }
   0xb   : > { %180 = vperm.xlu0 (!%p137_p2), %353, %v172_v3  }
   0xd   : > { %s417_s13 = smov (!%p159_p3, %s323_s13), 1 }
   0xe   : > { %s328_s20 = sshll.u32 %s417_s13, 3  ;;  %s335_s26 = sshll.u32 %s417_s13, 4 }
   0xf   : > { %s162_s23 = scalar_lea.vmem %s412_s0, %s328_s20  ;;  %s167_s29 = scalar_lea.vmem %s415_s3, %s335_s26 }
  0x10   : > { %v170_v4 = vld [vmem:[%s162_s23] sm:$0xff] }
  0x11   : > { %339 = vmatprep.subr.mxu0 %v170_v4 }
  0x12   : > { %340 = vmatpush3.msra.mxu0 %v170_v4 }
  0x13   : > { %342 = vmatmul.mubr.msk.f32.vlgmr.msra.gmra.mrb[0].mxu0 %vm183_vm0, %v169_v5 }
  0x86   : > { %v176_v6 = vpop.permute.xlu0 %175 }
  0x8a   : > { %v181_v7 = vpop.permute.xlu0 %180 }
  0xe6   : > { %v343_v8 = vpop.f32.mrb[0].mxu0 }
  0xe7   : > { %v262_v9 = vadd.f32 %v343_v8, %v181_v7  ;;  %v256_v10 = vpop.f32.mrb[1].mxu0 }
  0xe8   : > { %v257_v11 = vadd.f32 %v256_v10, %v176_v6 }
  0xe9   : > { %267 = vst.msk [vmem:[%s167_s29 + $0x8] sm:$0xff] %vm265_vm1, %v262_v9 }
  0xea   : > { %266 = vst.msk [vmem:[%s167_s29] sm:$0xff] %vm265_vm1, %v257_v11 }
  0xeb PF: > { %s13_s12 = sadd.s32 1, %s360_s12  }
  0xec   : > { %p10_p4 = scmp.ge.s32.totalorder %s13_s12, 4  }
  0xee   :  { %12 = sbr.rel (!%p10_p4) target bundleno = 1 (0x1), region = 62 }

// kernel: decode_block_forward.5
= control target key start
LH: loop header
LB: loop body
LE: loop exit
PB: predicated region body
PF: predicated region fallthrough
CT: control target
= control target key end

     0   :  { %s856_s27 = smov 0   ;;  %s907_s0 = inlined_call_operand.vmem [shape: f32[2,4,256], index: 0, kind: input, shape index: {}]   ;;  %s908_s1 = inlined_call_operand.vmem [shape: f32[2,4,256], index: 1, kind: input, shape index: {}]   ;;  %s909_s2 = inlined_call_operand.vmem [shape: f32[2,8,1], index: 2, kind: input, shape index: {}]   ;;  %s910_s3 = inlined_call_operand.vmem [shape: f32[1,256], index: 3, kind: input, shape index: {}]   ;;  %s911_s4 = inlined_call_operand.vmem [shape: f32[4,32], index: 4, kind: input, shape index: {}]   ;;  %s912_s5 = inlined_call_operand.vmem [shape: f32[4,1], index: 5, kind: input, shape index: {}]   ;;  %s913_s6 = inlined_call_operand.vmem [shape: f32[2,4,256], index: 6, kind: output, shape index: {0}]   ;;  %s914_s7 = inlined_call_operand.vmem [shape: f32[2,4,1], index: 7, kind: output, shape index: {1}]   ;;  %s915_s8 = inlined_call_operand.vmem [shape: f32[2,4,1], index: 8, kind: output, shape index: {2}]  }
   0x1 LB: > { %s750_s28 = sadd.s32 4294967295, %s801_s27   ;;  %p754_p0 = scmp.ge.s32.totalorder %s801_s27, 1  ;;  %s801_s27 = sphi %s856_s27, %s19_s27  }
   0x2   : > { %p286_p1 = scmp.lt.s32.totalorder %s801_s27, 3 }
   0x4   : > { %p287_p2 = pnand %p754_p0, %p286_p1 }
   0x5   : > { %p337_p3 = scmp.lt.s32.totalorder (!%p287_p2), %s750_s28, 1  ;;  %v373_v0 = vlaneseq (!%p287_p2)  ;;  %v803_v1 = vmov (!%p287_p2), 0   ;;  %v418_v3 = vld [vmem:[%s910_s3] sm:$0x3] (!%p287_p2)  ;;  %s804_s13 = smov (!%p287_p2), 1   ;;  %v806_v13 = vmov (!%p287_p2), 0.0  }
   0x6   : > { %290 = sbr.rel (%p287_p2) target bundleno = 661 (0x295), region = 44  ;;  %794 = vset.pattern.permute.xlu0 (!%p287_p2), %v803_v1  ;;  %v466_v10 = vld [vmem:[%s910_s3] sm:$0x3] (!%p287_p2)  ;;  %s805_s16 = smov (!%p287_p2), 17   ;;  %409 = vst [vmem:[#allocation3 + $0x28] sm:$0xff] (!%p287_p2), %v806_v13  ;;  %407 = vst [vmem:[#allocation3 + $0x18] sm:$0xff] (!%p287_p2), %v806_v13  ;;  %581 = vmatprep.mubr.f32.mxu0 (!%p287_p2), %v806_v13 }
   0x7   : > { %v374_v2 = vshrl.u32 (!%p287_p2), %v373_v0, 7  ;;  %411 = vst [vmem:[#allocation3 + $0x38] sm:$0xff] (!%p287_p2), %v806_v13  ;;  %v807_v14 = vmov (!%p287_p2), 839922192   ;;  %vm432_vm0 = vcmask (!%p287_p2), 7168   ;;  %vm480_vm1 = vcmask (!%p287_p2), 138240  }
   0x8   : > { %v371_v15 = vunpack.c.l.s4 (!%p287_p2), %v807_v14  ;;  %s808_s23 = smov (!%p287_p2), 112   ;;  %s809_s24 = smov (!%p287_p2), 127   ;;  %v507_v40 = vld [vmem:[%s912_s5] sm:$0xf] (!%p287_p2)  ;;  %vm458_vm2 = vcmask (!%p287_p2), 916480   ;;  %vm444_vm3 = vcmask (!%p287_p2), 1039360  }
   0x9   : > { %v422_v4 = vsub.s32 (!%p287_p2), 0, %v374_v2  ;;  %v426_v5 = vsub.s32 (!%p287_p2), 1, %v374_v2  ;;  %s810_s25 = smov (!%p287_p2), 111   ;;  %vm492_vm4 = vcmask (!%p287_p2), 908288   ;;  %v498_v57 = vld [vmem:[%s911_s4] sm:$0xf] (!%p287_p2) }
   0xa   : > { %v372_v16 = vunpack.c.0.s8 (!%p287_p2), %v371_v15  ;;  %vm513_vm5 = vcmask (!%p287_p2), 261120   ;;  %vm593_vm6 = vcmask (!%p287_p2), 1043456   ;;  %vm599_vm7 = vcmask (!%p287_p2), 3072  }
   0xb   : > { %v423_v7 = vrot.slane (!%p287_p2), %v418_v3, %v422_v4  ;;  %v427_v9 = vrot.slane (!%p287_p2), %v418_v3, %v426_v5  ;;  %v471_v11 = vrot.slane (!%p287_p2), %v466_v10, %v422_v4  ;;  %v475_v12 = vrot.slane (!%p287_p2), %v466_v10, %v426_v5 }
   0xc   : > { %v375_v17 = vsub.s32 (!%p287_p2), %v372_v16, %v374_v2 }
   0xd   : > { %s917_s28 = smov (!%p337_p3, %s750_s28), 1  ;;  %428 = vrot.lane.b32.xlu1 %v423_v7, %s804_s13 }
   0xe   : > { %s870_s9 = sshll.u32 %s917_s28, 3  ;;  %s762_s14 = sshll.u32 %s917_s28, 2 }
   0xf   : > { %s350_s12 = scalar_lea.vmem %s909_s2, %s870_s9  ;;  %s341_s19 = scalar_lea.vmem %s907_s0, %s870_s9 }
  0x10   : > { %v365_v6 = vld [vmem:[%s350_s12] sm:$0xf]  ;;  %v385_v8 = vld [vmem:[%s350_s12 + $0x4] sm:$0xf]  ;;  %s346_s22 = scalar_lea.vmem %s908_s1, %s870_s9  ;;  %s359_s17 = scalar_lea.vmem %s914_s7, %s762_s14 }
  0x11   : > { %368 = vperm.xlu0 %794, %v365_v6   ;;  %430 = vrot.lane.b32.xlu1 %v427_v9, %s804_s13  ;;  %v364_v19 = vld [vmem:[%s341_s19] sm:$0xff]  ;;  %s355_s13 = scalar_lea.vmem %s913_s6, %s870_s9  ;;  %s363_s19 = scalar_lea.vmem %s915_s8, %s762_s14 }
  0x12   : > { %v384_v23 = vld [vmem:[%s346_s22] sm:$0xff] }
  0x15   : > { %388 = vperm.xlu0 %794, %v385_v8   ;;  %478 = vrot.lane.b32.xlu1 %v475_v12, %s805_s16 }
  0x19   : > { %476 = vrot.lane.b32.xlu0 %v471_v11, %s805_s16 }
  0x7f   : > { %v429_v26 = vpop.permute.xlu1 %428 }
  0x83   : > { %v431_v29 = vpop.permute.xlu1 %430 }
  0x84   : > { %v433_v34 = vsel %vm432_vm0, %v429_v26, %v431_v29 }
  0x87   : > { %v479_v31 = vpop.permute.xlu1 %478 }
  0x90   : > { %v369_v18 = vpop.permute.xlu0 %368 }
  0x91   : > { %v376_v20 = vrot.slane %v369_v18, %v375_v17 }
  0x93   : > { %v378_v21 = vadd.f32 %v376_v20, %v364_v19 }
  0x94   : > { %v389_v22 = vpop.permute.xlu0 %388 }
  0x95   : > { %v380_v24 = vcombine.high %v378_v21, %v378_v21  ;;  %382 = vst [vmem:[#allocation2] sm:$0xf] %v378_v21  ;;  %v396_v25 = vrot.slane %v389_v22, %v375_v17 }
  0x97   : > { %383 = vst [vmem:[#allocation2 + $0x8] sm:$0xf] %v380_v24  ;;  %v398_v27 = vadd.f32 %v396_v25, %v384_v23 }
  0x98   : > { %v477_v32 = vpop.permute.xlu0 %476 }
  0x99   : > { %v400_v28 = vcombine.low %v398_v27, %v398_v27  ;;  %403 = vst [vmem:[#allocation2 + $0x8] sm:$0xf0] %v398_v27  ;;  %v481_v36 = vsel %vm480_vm1, %v477_v32, %v479_v31 }
  0x9b   : > { %402 = vst [vmem:[#allocation2] sm:$0xf0] %v400_v28 }
  0xa0   : > { %v417_v30 = vld [vmem:[#allocation2 + $0x8] sm:$0xff] }
  0xa1   : > { %456 = vrot.lane.b32.xlu1 %v417_v30, %s808_s23  ;;  %v437_v35 = vmul.f32 %v433_v34, %v417_v30  ;;  %v485_v38 = vmul.f32 %v481_v36, %v417_v30 }
  0xa2   : > { %v416_v33 = vld [vmem:[#allocation2] sm:$0xff] }
  0xa3   : > { %454 = vrot.lane.b32.xlu0 %v416_v33, %s808_s23  ;;  %v436_v37 = vmul.f32 %v429_v26, %v416_v33  ;;  %v484_v39 = vmul.f32 %v477_v32, %v416_v33 }
  0xa5   : > { %442 = vrot.lane.b32.xlu1 %v437_v35, %s809_s24 }
  0xa7   : > { %440 = vrot.lane.b32.xlu0 %v436_v37, %s809_s24 }
  0xa9   : > { %490 = vrot.lane.b32.xlu1 %v485_v38, %s810_s25 }
  0xab   : > { %488 = vrot.lane.b32.xlu0 %v484_v39, %s810_s25 }
  0xaf   : > { %510 = vperm.xlu0 %794, %v507_v40  }
 0x113   : > { %v457_v41 = vpop.permute.xlu1 %456 }
 0x114   : > { %463 = vst.msk [vmem:[#allocation3 + $0x28] sm:$0xff] %vm458_vm2, %v457_v41 }
 0x115   : > { %v455_v42 = vpop.permute.xlu0 %454 }
 0x116   : > { %v459_v43 = vsel %vm458_vm2, %v455_v42, %v457_v41 }
 0x117   : > { %v443_v44 = vpop.permute.xlu1 %442 }
 0x118   : > { %449 = vst.msk [vmem:[#allocation3 + $0x18] sm:$0xff] %vm444_vm3, %v443_v44 }
 0x119   : > { %v441_v45 = vpop.permute.xlu0 %440 }
 0x11a   : > { %v445_v46 = vsel %vm444_vm3, %v441_v45, %v443_v44 }
 0x11b   : > { %v491_v47 = vpop.permute.xlu1 %490  ;;  %v772_v52 = vpack.c.bf16 %v445_v46, %v416_v33  ;;  %v504_v53 = vld [vmem:[#allocation3 + $0x28] sm:$0xff] }
 0x11c   : > { %497 = vst.msk [vmem:[#allocation3 + $0x38] sm:$0xff] %vm492_vm4, %v491_v47 }
 0x11d   : > { %v489_v48 = vpop.permute.xlu0 %488 }
 0x11e   : > { %v493_v49 = vsel %vm492_vm4, %v489_v48, %v491_v47 }
 0x11f   : > { %v502_v50 = vld [vmem:[#allocation3 + $0x18] sm:$0xff]  ;;  %v776_v56 = vpack.c.bf16 %v493_v49, %v459_v43 }
 0x120   : > { %v770_v51 = vpack.c.bf16 %v502_v50, %v417_v30 }
 0x122   : > { %771 = vmatprep.subr.bf16.mxu0 %v770_v51 }
 0x123   : > { %773 = vmatpush1.bf16.msra.mxu0 %v772_v52  ;;  %v506_v54 = vld [vmem:[#allocation3 + $0x38] sm:$0xff] }
 0x124   : > { %v774_v55 = vpack.c.bf16 %v506_v54, %v504_v53 }
 0x126   : > { %775 = vmatprep.subr.bf16.mxu0 %v774_v55 }
 0x127   : > { %777 = vmatpush1.bf16.msra.mxu0 %v776_v56 }
 0x12a   : > { %764 = vmatmul.mubr.msk.f32.vlgmr.msra.gmra.mrb[0].mxu0 %vm513_vm5, %v498_v57 }
 0x12e   : > { %v511_v58 = vpop.permute.xlu0 %510 }
 0x1fd   : > { %v583_v59 = vpop.f32.mrb[0].mxu0 }
 0x1fe   : > { %v584_v60 = vadd.f32 %v583_v59, %v511_v58  ;;  %v585_v61 = vpop.f32.mrb[1].mxu0 }
 0x1ff   : > { %v586_v62 = vadd.f32 %v585_v61, %v511_v58 }
 0x200   : > { %v594_v63 = vsel %vm593_vm6, %v584_v60, 0.0  ;;  %v601_v0 = vmul.f32 %v584_v60, %v584_v60 }
 0x201   : > { %v590_v1 = vcombine.low %v584_v60, %v586_v62  ;;  %v595_v2 = vsel %vm593_vm6, %v586_v62, 0.0  ;;  %v602_v3 = vmul.f32 %v586_v62, %v586_v62 }
 0x202   : > { %v596_v4 = vadd.f32 %v595_v2, %v594_v63  ;;  %v603_v5 = vsel %vm593_vm6, %v601_v0, 0.0 }
 0x203   : > { %592 = vst [vmem:[%s355_s13] sm:$0xff] %v590_v1  ;;  %v604_v6 = vsel %vm593_vm6, %v602_v3, 0.0 }
 0x204   : > { %597 = vadd.xlane.f32.xlu1 %v596_v4  ;;  %v605_v7 = vadd.f32 %v604_v6, %v603_v5 }
 0x206   : > { %606 = vadd.xlane.f32.xlu0 %v605_v7 }
 0x291   : > { %v598_v8 = vpop.xlane.xlu1 %597 }
 0x292   : > { %600 = vst.msk [vmem:[%s359_s17] sm:$0xf] %vm599_vm7, %v598_v8 }
 0x293   : > { %v607_v9 = vpop.xlane.xlu0 %606 }
 0x294   : > { %608 = vst.msk [vmem:[%s363_s19] sm:$0xf] %vm599_vm7, %v607_v9 }
 0x295 PF: > { %s19_s27 = sadd.s32 1, %s801_s27  }
 0x296   : > { %p16_p4 = scmp.ge.s32.totalorder %s19_s27, 4  }
 0x298   :  { %18 = sbr.rel (!%p16_p4) target bundleno = 1 (0x1), region = 104 }

// kernel: decode_block_forward.7
= control target key start
LH: loop header
LB: loop body
LE: loop exit
PB: predicated region body
PF: predicated region fallthrough
CT: control target
= control target key end

     0   :  { %s306_s12 = smov 0   ;;  %s329_s0 = inlined_call_operand.vmem [shape: f32[2,4,256], index: 0, kind: input, shape index: {}]   ;;  %s330_s1 = inlined_call_operand.vmem [shape: f32[4,1], index: 1, kind: input, shape index: {}]   ;;  %s331_s2 = inlined_call_operand.vmem [shape: f32[4,1], index: 2, kind: input, shape index: {}]   ;;  %s332_s3 = inlined_call_operand.vmem [shape: f32[2,4,256], index: 3, kind: output, shape index: {}]  }
   0x1 LB: > { %s253_s13 = sadd.s32 4294967295, %s283_s12   ;;  %p257_p0 = scmp.ge.s32.totalorder %s283_s12, 1  ;;  %s283_s12 = sphi %s306_s12, %s13_s12  }
   0x2   : > { %p137_p1 = scmp.lt.s32.totalorder %s283_s12, 3 }
   0x4   : > { %p138_p2 = pnand %p257_p0, %p137_p1 }
   0x5   : > { %v171_v0 = vld [vmem:[%s330_s1] sm:$0xf] (!%p138_p2)  ;;  %v285_v1 = vmov (!%p138_p2), 0   ;;  %p161_p3 = scmp.lt.s32.totalorder (!%p138_p2), %s253_s13, 1 }
   0x6   : > { %141 = sbr.rel (%p138_p2) target bundleno = 146 (0x92), region = 32  ;;  %275 = vset.pattern.permute.xlu0 (!%p138_p2), %v285_v1  ;;  %v183_v2 = vld [vmem:[%s331_s2] sm:$0xf] (!%p138_p2) }
   0x7   : > { %175 = vperm.xlu0 (!%p138_p2), %275, %v171_v0  }
   0xb   : > { %186 = vperm.xlu0 (!%p138_p2), %275, %v183_v2  }
   0xd   : > { %s334_s13 = smov (!%p161_p3, %s253_s13), 1 }
   0xe   : > { %s264_s18 = sshll.u32 %s334_s13, 3 }
   0xf   : > { %s165_s21 = scalar_lea.vmem %s329_s0, %s264_s18  ;;  %s170_s24 = scalar_lea.vmem %s332_s3, %s264_s18 }
  0x10   : > { %v172_v3 = vld [vmem:[%s165_s21] sm:$0xff] }
  0x11   : > { %v179_v4 = vcombine.high %v172_v3, %v172_v3 }
  0x86   : > { %v176_v5 = vpop.permute.xlu0 %175 }
  0x87   : > { %v181_v6 = vmul.f32 %v176_v5, %v172_v3  ;;  %v182_v7 = vmul.f32 %v179_v4, %v176_v5 }
  0x8a   : > { %v187_v8 = vpop.permute.xlu0 %186 }
  0x8b   : > { %v189_v9 = vadd.f32 %v187_v8, %v181_v6  ;;  %v190_v10 = vadd.f32 %v187_v8, %v182_v7 }
  0x8d   : > { %v191_v11 = vmax.f32 %v189_v9, 0.0  ;;  %v192_v12 = vmax.f32 %v190_v10, 0.0 }
  0x8f   : > { %v195_v13 = vcombine.low %v191_v11, %v192_v12 }
  0x91   : > { %197 = vst [vmem:[%s170_s24] sm:$0xff] %v195_v13 }
  0x92 PF: > { %s13_s12 = sadd.s32 1, %s283_s12  }
  0x93   : > { %p10_p4 = scmp.ge.s32.totalorder %s13_s12, 4  }
  0x95   :  { %12 = sbr.rel (!%p10_p4) target bundleno = 1 (0x1), region = 62 }

// kernel: decode_block_forward.6
= control target key start
LH: loop header
LB: loop body
LE: loop exit
PB: predicated region body
PF: predicated region fallthrough
CT: control target
= control target key end

     0   :  { %s835_s30 = smov 0   ;;  %s892_s0 = inlined_call_operand.vmem [shape: f32[2,4,256], index: 0, kind: input, shape index: {}]   ;;  %s893_s1 = inlined_call_operand.vmem [shape: f32[4,1], index: 1, kind: input, shape index: {}]   ;;  %s894_s2 = inlined_call_operand.vmem [shape: f32[4,1], index: 2, kind: input, shape index: {}]   ;;  %s895_s3 = inlined_call_operand.vmem [shape: f32[2,4,1], index: 3, kind: input, shape index: {}]   ;;  %s896_s4 = inlined_call_operand.vmem [shape: f32[1,256], index: 4, kind: input, shape index: {}]   ;;  %s897_s5 = inlined_call_operand.vmem [shape: f32[4,16], index: 5, kind: input, shape index: {}]   ;;  %s898_s6 = inlined_call_operand.vmem [shape: f32[4,1], index: 6, kind: input, shape index: {}]   ;;  %s899_s7 = inlined_call_operand.vmem [shape: f32[2,4,256], index: 7, kind: output, shape index: {0}]   ;;  %s900_s8 = inlined_call_operand.vmem [shape: f32[2,4,1], index: 8, kind: output, shape index: {1}]   ;;  %s901_s9 = inlined_call_operand.vmem [shape: f32[2,4,1], index: 9, kind: output, shape index: {2}]  }
   0x1 LB: > { %s730_s10 = sadd.s32 4294967295, %s776_s30   ;;  %p734_p0 = scmp.ge.s32.totalorder %s776_s30, 1  ;;  %s776_s30 = sphi %s835_s30, %s20_s30  }
   0x2   : > { %p301_p1 = scmp.lt.s32.totalorder %s776_s30, 3 }
   0x4   : > { %p302_p2 = pnand %p734_p0, %p301_p1 }
   0x5   : > { %v371_v0 = vld [vmem:[%s893_s1] sm:$0xf] (!%p302_p2)  ;;  %p349_p3 = scmp.lt.s32.totalorder (!%p302_p2), %s730_s10, 1  ;;  %v419_v1 = vlaneseq (!%p302_p2)  ;;  %v778_v2 = vmov (!%p302_p2), 0   ;;  %s779_s23 = smov (!%p302_p2), 17   ;;  %v781_v16 = vmov (!%p302_p2), 0.0  }
   0x6   : > { %305 = sbr.rel (%p302_p2) target bundleno = 652 (0x28c), region = 48  ;;  %767 = vset.pattern.permute.xlu0 (!%p302_p2), %v778_v2  ;;  %768 = vset.pattern.permute.xlu1 (!%p302_p2), %v778_v2  ;;  %v383_v4 = vld [vmem:[%s894_s2] sm:$0xf] (!%p302_p2)  ;;  %s780_s24 = smov (!%p302_p2), 1   ;;  %409 = vst [vmem:[#allocation3 + $0x18] sm:$0xff] (!%p302_p2), %v781_v16  ;;  %406 = vst [vmem:[#allocation3] sm:$0xff] (!%p302_p2), %v781_v16 }
   0x7   : > { %375 = vperm.xlu0 (!%p302_p2), %767, %v371_v0   ;;  %v420_v3 = vshrl.u32 (!%p302_p2), %v419_v1, 7  ;;  %v463_v5 = vld [vmem:[%s896_s4] sm:$0x3] (!%p302_p2)  ;;  %407 = vst [vmem:[#allocation3 + $0x8] sm:$0xff] (!%p302_p2), %v781_v16  ;;  %408 = vst [vmem:[#allocation3 + $0x10] sm:$0xff] (!%p302_p2), %v781_v16  ;;  %573 = vmatprep.mubr.f32.mxu0 (!%p302_p2), %v781_v16  ;;  %vm477_vm0 = vcmask (!%p302_p2), 138240  }
   0x8   : > { %v417_v6 = vld [vmem:[%s896_s4] sm:$0x3] (!%p302_p2)  ;;  %vm431_vm1 = vcmask (!%p302_p2), 7168   ;;  %s782_s29 = smov (!%p302_p2), 112   ;;  %s783_s11 = smov (!%p302_p2), 127   ;;  %vm460_vm2 = vcmask (!%p302_p2), 912384  }
   0x9   : > { %v421_v7 = vsub.s32 (!%p302_p2), 0, %v420_v3  ;;  %v425_v8 = vsub.s32 (!%p302_p2), 1, %v420_v3  ;;  %s784_s12 = smov (!%p302_p2), 111   ;;  %v499_v42 = vld [vmem:[%s898_s6] sm:$0xf] (!%p302_p2)  ;;  %vm455_vm3 = vcmask (!%p302_p2), 916480  }
   0xa   : > { %vm446_vm4 = vcmask (!%p302_p2), 1039364   ;;  %vm441_vm5 = vcmask (!%p302_p2), 1039360   ;;  %vm492_vm6 = vcmask (!%p302_p2), 908292   ;;  %vm487_vm7 = vcmask (!%p302_p2), 908288   ;;  %v494_v58 = vld [vmem:[%s897_s5] sm:$0xf] (!%p302_p2) }
   0xb   : > { %386 = vperm.xlu0 (!%p302_p2), %767, %v383_v4   ;;  %v468_v10 = vrot.slane (!%p302_p2), %v463_v5, %v421_v7  ;;  %v472_v11 = vrot.slane (!%p302_p2), %v463_v5, %v425_v8  ;;  %v422_v12 = vrot.slane (!%p302_p2), %v417_v6, %v421_v7  ;;  %v426_v13 = vrot.slane (!%p302_p2), %v417_v6, %v425_v8 }
   0xc   : > { %vm505_vm8 = vcmask (!%p302_p2), 130048   ;;  %vm585_vm9 = vcmask (!%p302_p2), 1043456   ;;  %vm591_vm10 = vcmask (!%p302_p2), 3072  }
   0xd   : > { %s903_s10 = smov (!%p349_p3, %s730_s10), 1  ;;  %v473_v14 = vcombine.low %v468_v10, %v472_v11  ;;  %v427_v15 = vcombine.low %v422_v12, %v426_v13 }
   0xe   : > { %s858_s19 = sshll.u32 %s903_s10, 2  ;;  %s745_s25 = sshll.u32 %s903_s10, 3 }
   0xf   : > { %s357_s22 = scalar_lea.vmem %s895_s3, %s858_s19  ;;  %474 = vrot.lane.b32.xlu0 %v473_v14, %s779_s23  ;;  %s353_s28 = scalar_lea.vmem %s892_s0, %s745_s25 }
  0x10   : > { %v393_v9 = vld [vmem:[%s357_s22] sm:$0xf]  ;;  %s362_s20 = scalar_lea.vmem %s899_s7, %s745_s25  ;;  %s366_s10 = scalar_lea.vmem %s900_s8, %s858_s19 }
  0x11   : > { %396 = vperm.xlu1 %768, %v393_v9   ;;  %v372_v17 = vld [vmem:[%s353_s28] sm:$0xff]  ;;  %s370_s25 = scalar_lea.vmem %s901_s9, %s858_s19 }
  0x12   : > { %v379_v18 = vcombine.high %v372_v17, %v372_v17 }
  0x15   : > { %428 = vrot.lane.b32.xlu1 %v427_v15, %s780_s24 }
  0x86   : > { %v376_v19 = vpop.permute.xlu0 %375 }
  0x87   : > { %v381_v20 = vmul.f32 %v376_v19, %v372_v17  ;;  %v382_v21 = vmul.f32 %v379_v18, %v376_v19 }
  0x8a   : > { %v387_v22 = vpop.permute.xlu0 %386 }
  0x8b   : > { %v389_v23 = vadd.f32 %v387_v22, %v381_v20  ;;  %v390_v24 = vadd.f32 %v387_v22, %v382_v21 }
  0x8d   : > { %v391_v26 = vmax.f32 %v389_v23, 0.0  ;;  %v392_v27 = vmax.f32 %v390_v24, 0.0 }
  0x8e   : > { %v475_v28 = vpop.permute.xlu0 %474 }
  0x8f   : > { %v476_v31 = vrot.slane %v475_v28, 4 }
  0x90   : > { %v397_v25 = vpop.permute.xlu1 %396 }
  0x91   : > { %v399_v29 = vadd.f32 %v397_v25, %v391_v26  ;;  %v400_v30 = vadd.f32 %v397_v25, %v392_v27  ;;  %v478_v36 = vsel %vm477_vm0, %v476_v31, %v475_v28 }
  0x93   : > { %v403_v34 = vcombine.low %v399_v29, %v400_v30  ;;  %v747_v35 = vcombine.low %v400_v30, %v400_v30 }
  0x94   : > { %v429_v32 = vpop.permute.xlu1 %428 }
  0x95   : > { %v430_v33 = vrot.slane %v429_v32, 4  ;;  %453 = vrot.lane.b32.xlu0 %v747_v35, %s782_s29  ;;  %451 = vrot.lane.b32.xlu1 %v403_v34, %s782_s29  ;;  %414 = vst [vmem:[#allocation3] sm:$0xf] %v403_v34  ;;  %415 = vst [vmem:[#allocation3 + $0x8] sm:$0xf] %v747_v35  ;;  %v480_v39 = vmul.f32 %v478_v36, %v403_v34 }
  0x97   : > { %v432_v37 = vsel %vm431_vm1, %v430_v33, %v429_v32  ;;  %v482_v41 = vcombine.low %v480_v39, %v480_v39 }
  0x98   : > { %v434_v38 = vmul.f32 %v432_v37, %v403_v34 }
  0x9a   : > { %v436_v40 = vcombine.low %v434_v38, %v434_v38  ;;  %439 = vrot.lane.b32.xlu0 %v434_v38, %s783_s11 }
  0x9c   : > { %437 = vrot.lane.b32.xlu1 %v436_v40, %s783_s11 }
  0x9e   : > { %485 = vrot.lane.b32.xlu0 %v480_v39, %s784_s12 }
  0xa0   : > { %483 = vrot.lane.b32.xlu1 %v482_v41, %s784_s12 }
  0xa4   : > { %502 = vperm.xlu1 %768, %v499_v42  }
 0x107   : > { %v454_v43 = vpop.permute.xlu0 %453  ;;  %v452_v44 = vpop.permute.xlu1 %451 }
 0x108   : > { %461 = vst.msk [vmem:[#allocation3 + $0x18] sm:$0xf] %vm460_vm2, %v454_v43  ;;  %v456_v45 = vsel %vm455_vm3, %v452_v44, %v454_v43 }
 0x109   : > { %459 = vst [vmem:[#allocation3 + $0x10] sm:$0xf] %v456_v45 }
 0x10c   : > { %v440_v46 = vpop.permute.xlu0 %439 }
 0x10d   : > { %447 = vst.msk [vmem:[#allocation3 + $0x8] sm:$0xf0] %vm446_vm4, %v440_v46 }
 0x10e   : > { %v438_v47 = vpop.permute.xlu1 %437 }
 0x10f   : > { %v442_v48 = vsel %vm441_vm5, %v438_v47, %v440_v46 }
 0x110   : > { %445 = vst [vmem:[#allocation3] sm:$0xf0] %v442_v48  ;;  %v486_v49 = vpop.permute.xlu0 %485 }
 0x111   : > { %493 = vst.msk [vmem:[#allocation3 + $0x18] sm:$0xf0] %vm492_vm6, %v486_v49 }
 0x112   : > { %v484_v50 = vpop.permute.xlu1 %483 }
 0x113   : > { %v488_v51 = vsel %vm487_vm7, %v484_v50, %v486_v49 }
 0x114   : > { %491 = vst [vmem:[#allocation3 + $0x10] sm:$0xf0] %v488_v51  ;;  %v496_v52 = vld [vmem:[#allocation3 + $0x8] sm:$0xff] }
 0x117   : > { %v495_v55 = vld [vmem:[#allocation3] sm:$0xff] }
 0x118   : > { %v498_v53 = vld [vmem:[#allocation3 + $0x18] sm:$0xff] }
 0x119   : > { %v748_v54 = vpack.c.bf16 %v498_v53, %v496_v52 }
 0x11b   : > { %v497_v56 = vld [vmem:[#allocation3 + $0x10] sm:$0xff]  ;;  %749 = vmatprep.subr.bf16.mxu0 %v748_v54 }
 0x11c   : > { %v750_v57 = vpack.c.bf16 %v497_v56, %v495_v55 }
 0x11e   : > { %751 = vmatpush1.bf16.msra.mxu0 %v750_v57 }
 0x121   : > { %742 = vmatmul.mubr.msk.f32.vlgmr.msra.gmra.mrb[0].mxu0 %vm505_vm8, %v494_v58 }
 0x123   : > { %v503_v59 = vpop.permute.xlu1 %502 }
 0x1f4   : > { %v575_v60 = vpop.f32.mrb[0].mxu0 }
 0x1f5   : > { %v576_v61 = vadd.f32 %v575_v60, %v503_v59  ;;  %v577_v62 = vpop.f32.mrb[1].mxu0 }
 0x1f6   : > { %v578_v63 = vadd.f32 %v577_v62, %v503_v59 }
 0x1f7   : > { %v586_v0 = vsel %vm585_vm9, %v576_v61, 0.0  ;;  %v593_v1 = vmul.f32 %v576_v61, %v576_v61 }
 0x1f8   : > { %v582_v2 = vcombine.low %v576_v61, %v578_v63  ;;  %v587_v3 = vsel %vm585_vm9, %v578_v63, 0.0  ;;  %v594_v4 = vmul.f32 %v578_v63, %v578_v63 }
 0x1f9   : > { %v588_v5 = vadd.f32 %v587_v3, %v586_v0  ;;  %v595_v6 = vsel %vm585_vm9, %v593_v1, 0.0 }
 0x1fa   : > { %584 = vst [vmem:[%s362_s20] sm:$0xff] %v582_v2  ;;  %v596_v7 = vsel %vm585_vm9, %v594_v4, 0.0 }
 0x1fb   : > { %589 = vadd.xlane.f32.xlu0 %v588_v5  ;;  %v597_v8 = vadd.f32 %v596_v7, %v595_v6 }
 0x1fd   : > { %598 = vadd.xlane.f32.xlu1 %v597_v8 }
 0x288   : > { %v590_v9 = vpop.xlane.xlu0 %589 }
 0x289   : > { %592 = vst.msk [vmem:[%s366_s10] sm:$0xf] %vm591_vm10, %v590_v9 }
 0x28a   : > { %v599_v10 = vpop.xlane.xlu1 %598 }
 0x28b   : > { %600 = vst.msk [vmem:[%s370_s25] sm:$0xf] %vm591_vm10, %v599_v10 }
 0x28c PF: > { %s20_s30 = sadd.s32 1, %s776_s30  }
 0x28d   : > { %p17_p4 = scmp.ge.s32.totalorder %s20_s30, 4  }
 0x28f   :  { %19 = sbr.rel (!%p17_p4) target bundleno = 1 (0x1), region = 105 }

</bundles_post_ra>
